<compile_context>
chip_gen: v6e
topology: v6e:2x2x1
jax: 0.10.0
libtpu: 0.0.40
codegen_flags: <defaults>
</compile_context>

<pallas_src>
import math

import jax
import jax.numpy as jnp
from jax.experimental import pallas as pl
from jax.experimental.pallas import tpu as pltpu


# --------------------------------------------------------------------------
# helpers
# --------------------------------------------------------------------------
def _round_up(a, b):
    return (a + b - 1) // b * b


def _block_bytes(rows, cols, itemsize):
    """VMEM footprint of one (rows, cols) block after (8, 128) tiling."""
    return _round_up(rows, 8) * _round_up(cols, 128) * itemsize


def _vmem_capacity_bytes():
    """Physical VMEM of the attached TPU; 64 MiB (v7x floor) fallback."""
    try:
        info = pltpu.get_tpu_info()
        cap = getattr(info, "vmem_capacity_bytes", None)
        if cap:
            return int(cap)
    except Exception:
        pass
    return 64 * 1024 * 1024


def _num_tensorcores():
    """TensorCores per chip (2 on v7x); conservatively 1 if undetectable."""
    try:
        info = pltpu.get_tpu_info()
        for name in ("num_cores", "core_count", "tensorcore_count", "num_tensorcores"):
            v = getattr(info, name, None)
            if isinstance(v, int) and v > 0:
                return v
    except Exception:
        pass
    return 1


def _choose_tm(M, m_align, tm_target, ncores):
    """Row tile: large enough to amortize weight streaming (roofline), small
    enough to avoid large ragged-M padding, and capped so the parallel M axis
    has >= 2*ncores tiles once there is enough work to split (v7x megacore)."""
    Mp_min = _round_up(M, m_align)
    if Mp_min <= tm_target:
        tm = Mp_min
    else:
        cands = sorted({max(m_align, _round_up(c, m_align))
                        for c in (tm_target, 512, 384, 256, 128)}, reverse=True)
        tm = None
        for c in cands:
            if _round_up(M, c) - M <= max(M // 16, m_align):  # <= ~6% padded rows
                tm = c
                break
        if tm is None:
            tm = min(cands, key=lambda c: (_round_up(M, c) - M, -c))
    if ncores >= 2 and M >= 256:
        cap = max(m_align, (Mp_min // (2 * ncores)) // m_align * m_align)
        tm = min(tm, cap)
    return tm


def _tiled_vmem_bytes(tm, tn, tf, Ep, x_item, w_item, b_item, o_item):
    """Conservative VMEM estimate for the tiled path (double-buffered I/O)."""
    return (2 * (_block_bytes(tm, Ep, x_item)      # x row tile
                 + _block_bytes(Ep, tf, w_item)    # W1 f-slice
                 + _block_bytes(1, tf, b_item)     # b1 f-slice
                 + _block_bytes(tf, tn, w_item)    # W2 (f, n) tile
                 + _block_bytes(1, tn, b_item)     # b2 n-slice
                 + _block_bytes(tm, tn, o_item))   # out tile
            + _block_bytes(tm, tn, 4))             # f32 accumulator scratch


def _pad_to(a, shape):
    pads = tuple((0, t - s) for s, t in zip(a.shape, shape))
    if all(p == 0 for _, p in pads):
        return a                                    # skip pad when lane-aligned
    return jnp.pad(a, pads)


# --------------------------------------------------------------------------
# kernels
# --------------------------------------------------------------------------
def ffn_kernel_resident(x_ref, w1_ref, b1_ref, w2_ref, b2_ref, o_ref):
    """Weights resident in VMEM; one shot per (tm, E) row tile, no scratch."""
    x = x_ref[...].astype(w1_ref.dtype)             # bf16 weights -> bf16 MXU path
    h = jnp.dot(x, w1_ref[...], preferred_element_type=jnp.float32)
    h = jnp.maximum(h + b1_ref[...], 0.0)
    y = jnp.dot(h.astype(w2_ref.dtype), w2_ref[...],
                preferred_element_type=jnp.float32)
    o_ref[...] = (y + b2_ref[...]).astype(o_ref.dtype)


def ffn_kernel_tiled(x_ref, w1_ref, b1_ref, w2_ref, b2_ref, o_ref, acc_ref):
    """Grid (i, n, f): row tile i, output-E tile n, hidden-F slice f (reduction)."""
    f = pl.program_id(2)

    @pl.when(f == 0)
    def _():
        # seed the accumulator with the broadcast output bias: saves the
        # separate zero-fill and the epilogue add
        acc_ref[...] = pl.broadcast_to(
            b2_ref[...].astype(jnp.float32), acc_ref.shape)

    x = x_ref[...].astype(w1_ref.dtype)             # bf16 weights -> bf16 MXU path
    h = jnp.dot(x, w1_ref[...], preferred_element_type=jnp.float32)
    h = jnp.maximum(h + b1_ref[...], 0.0)
    acc_ref[...] += jnp.dot(h.astype(w2_ref.dtype), w2_ref[...],
                            preferred_element_type=jnp.float32)

    @pl.when(f == pl.num_programs(2) - 1)
    def _():
        o_ref[...] = acc_ref[...].astype(o_ref.dtype)


# --------------------------------------------------------------------------
# wrapper
# --------------------------------------------------------------------------
def feed_forward(x, w1, b1, w2, b2, *, tm=None, tf=None, tn=None):
    """x: (..., E). w1: (E, F), b1: (F,), w2: (F, E), b2: (E,).

    Weights must be pre-transposed relative to PyTorch's nn.Linear (out, in).
    tm/tf/tn override the auto-selected row / hidden-F / output-E tiles.
    NOTE: weight padding is skipped when E, F are already multiples of 128;
    for a persistent model, pre-pad weights once at init to hoist the copy
    off the forward hot path.
    """
    orig_shape = x.shape
    E = orig_shape[-1]
    F = w1.shape[1]
    assert w1.shape == (E, F) and b1.shape == (F,)
    assert w2.shape == (F, E) and b2.shape == (E,)

    x2d = x.reshape(-1, E)
    M = x2d.shape[0]
    out_dtype = x.dtype

    x_item = x2d.dtype.itemsize
    w_item = w1.dtype.itemsize
    b_item = b1.dtype.itemsize
    o_item = x_item

    Ep = _round_up(E, 128)                       # lane-dense output columns
    Fp = _round_up(F, 128)
    m_align = max(8, 32 // x_item)               # f32:8, bf16:16, int8:32 sublanes

    vmem_cap = _vmem_capacity_bytes()
    budget = max(32 * 2**20, vmem_cap - 16 * 2**20)   # headroom for compiler scratch
    ncores = _num_tensorcores()

    # ---- row tile (roofline + ragged-M padding + megacore) --------------
    tm_target = 768 if w_item <= 2 else 256      # bf16 weights need ~640+ rows v6e/v7x
    if tm is None:
        tm = _choose_tm(M, m_align, tm_target, ncores)
    else:
        tm = max(m_align, min(_round_up(tm, m_align), _round_up(M, m_align)))

    # ---- weights-resident fast path --------------------------------------
    forced_tiles = (tf is not None) or (tn is not None)
    resident_bytes = 2 * (_block_bytes(tm, Ep, x_item)
                          + _block_bytes(Ep, Fp, w_item)
                          + _block_bytes(1, Fp, b_item)
                          + _block_bytes(Fp, Ep, w_item)
                          + _block_bytes(1, Ep, b_item)
                          + _block_bytes(tm, Ep, o_item))
    resident = (not forced_tiles) and resident_bytes <= budget

    if resident:
        tf, tn = Fp, Ep
        est_bytes = resident_bytes
    elif forced_tiles:
        tf = Fp if tf is None else min(_round_up(tf, 128), Fp)
        tn = Ep if tn is None else min(_round_up(tn, 128), Ep)
        Fp = _round_up(Fp, tf)
        Ep = _round_up(Ep, tn)
        est_bytes = _tiled_vmem_bytes(tm, tn, tf, Ep, x_item, w_item, b_item, o_item)
    else:
        def _cands(dim):
            return sorted({c for c in (dim, 2048, 1024, 512, 256, 128)
                           if c <= dim and dim % c == 0}, reverse=True)
        tf_cands, tn_cands = _cands(Fp), _cands(Ep)
        picked = None
        cur_tm = tm
        while picked is None:
            # prefer big tn (fewer W1 re-streams) then big tf (fewer acc passes)
            for tn_c in tn_cands:
                for tf_c in tf_cands:
                    b = _tiled_vmem_bytes(cur_tm, tn_c, tf_c, Ep,
                                          x_item, w_item, b_item, o_item)
                    if b <= budget:
                        picked = (cur_tm, tn_c, tf_c, b)
                        break
                if picked is not None:
                    break
            if picked is None:
                if cur_tm <= m_align:            # smallest possible; take it anyway
                    picked = (m_align, tn_cands[-1], tf_cands[-1],
                              _tiled_vmem_bytes(m_align, tn_cands[-1], tf_cands[-1],
                                                Ep, x_item, w_item, b_item, o_item))
                else:
                    cur_tm = max(m_align, _round_up(cur_tm // 2, m_align))
        tm, tn, tf, est_bytes = picked

    Mp = _round_up(M, tm)

    # ---- padding (exactly neutral for this op; skipped when aligned) -----
    xp = _pad_to(x2d, (Mp, Ep))
    w1p = _pad_to(w1, (Ep, Fp))
    b1p = _pad_to(b1.reshape(1, F), (1, Fp))
    w2p = _pad_to(w2, (Fp, Ep))
    b2p = _pad_to(b2.reshape(1, E), (1, Ep))

    # ---- advisory cost estimate (accounts for weight re-streaming) -------
    n_i, n_n = Mp // tm, Ep // tn
    flops = 4 * Mp * Ep * Fp                      # two matmuls: 2*M*E*F each
    if resident:
        w_traffic = (w1p.size + w2p.size) * w_item + (b1p.size + b2p.size) * b_item
    else:
        w_traffic = ((n_i * n_n * w1p.size + n_i * w2p.size) * w_item
                     + n_i * n_n * (b1p.size + b2p.size) * b_item)
    cost = pl.CostEstimate(
        flops=int(flops),
        transcendentals=0,
        bytes_accessed=int(xp.size * x_item + w_traffic + Mp * Ep * o_item))

    vmem_limit = int(min(vmem_cap, max(est_bytes + 16 * 2**20, 32 * 2**20)))

    if resident:
        out = pl.pallas_call(
            ffn_kernel_resident,
            out_shape=jax.ShapeDtypeStruct((Mp, Ep), out_dtype),
            grid_spec=pltpu.PrefetchScalarGridSpec(
                num_scalar_prefetch=0,
                grid=(Mp // tm,),
                in_specs=[
                    pl.BlockSpec((tm, Ep), lambda i: (i, 0)),   # x row tile (streams)
                    pl.BlockSpec((Ep, Fp), lambda i: (0, 0)),   # W1: DMA'd once, resident
                    pl.BlockSpec((1, Fp), lambda i: (0, 0)),    # b1: resident
                    pl.BlockSpec((Fp, Ep), lambda i: (0, 0)),   # W2: resident
                    pl.BlockSpec((1, Ep), lambda i: (0, 0)),    # b2: resident
                ],
                out_specs=pl.BlockSpec((tm, Ep), lambda i: (i, 0)),
            ),
            compiler_params=pltpu.CompilerParams(
                dimension_semantics=("parallel",),
                vmem_limit_bytes=vmem_limit,
            ),
            cost_estimate=cost,
        )(xp, w1p, b1p, w2p, b2p)
    else:
        out = pl.pallas_call(
            ffn_kernel_tiled,
            out_shape=jax.ShapeDtypeStruct((Mp, Ep), out_dtype),
            grid_spec=pltpu.PrefetchScalarGridSpec(
                num_scalar_prefetch=0,
                grid=(Mp // tm, Ep // tn, Fp // tf),
                in_specs=[
                    pl.BlockSpec((tm, Ep), lambda i, n, f: (i, 0)),   # x row tile
                    pl.BlockSpec((Ep, tf), lambda i, n, f: (0, f)),   # W1 f-slice
                    pl.BlockSpec((1, tf), lambda i, n, f: (0, f)),    # b1 f-slice
                    pl.BlockSpec((tf, tn), lambda i, n, f: (f, n)),   # W2 (f, n) tile
                    pl.BlockSpec((1, tn), lambda i, n, f: (0, n)),    # b2 n-slice
                ],
                out_specs=pl.BlockSpec((tm, tn), lambda i, n, f: (i, n)),
                scratch_shapes=[pltpu.VMEM((tm, tn), jnp.float32)],   # f32 accumulator
            ),
            compiler_params=pltpu.CompilerParams(
                dimension_semantics=("parallel", "parallel", "arbitrary"),
                vmem_limit_bytes=vmem_limit,
            ),
            cost_estimate=cost,
        )(xp, w1p, b1p, w2p, b2p)

    return out[:M, :E].reshape(orig_shape)


# --------------------------------------------------------------------------
# init + reference + test
# --------------------------------------------------------------------------
def init_params(key, embed_dim, ff_dim, dtype=jnp.float32):
    """Deterministic init matching nn.Linear's default U(-1/sqrt(fan_in), ...)."""
    k1, k2, k3, k4 = jax.random.split(key, 4)
    bound1 = 1.0 / math.sqrt(embed_dim)
    bound2 = 1.0 / math.sqrt(ff_dim)
    # stored as (in, out) = W.T relative to PyTorch's (out, in)
    w1 = jax.random.uniform(k1, (embed_dim, ff_dim), dtype, -bound1, bound1)
    b1 = jax.random.uniform(k2, (ff_dim,), dtype, -bound1, bound1)
    w2 = jax.random.uniform(k3, (ff_dim, embed_dim), dtype, -bound2, bound2)
    b2 = jax.random.uniform(k4, (embed_dim,), dtype, -bound2, bound2)
    return w1, b1, w2, b2


def ffn_ref(x, w1, b1, w2, b2):
    h = jnp.maximum(jnp.dot(x, w1, precision=jax.lax.Precision.HIGHEST) + b1, 0.0)
    return jnp.dot(h, w2, precision=jax.lax.Precision.HIGHEST) + b2


if __name__ == "__main__":
    key = jax.random.PRNGKey(0)
    kx, kp, kx2, kp2 = jax.random.split(key, 4)

    # --- toy shapes from the module: exercises the weights-resident path ---
    batch, seq, embed_dim, ff_dim = 2, 8, 32, 64
    x = jax.random.normal(kx, (batch, seq, embed_dim), jnp.float32)
    w1, b1, w2, b2 = init_params(kp, embed_dim, ff_dim)

    y = feed_forward(x, w1, b1, w2, b2)
    jax.block_until_ready(y)
    ref = ffn_ref(x, w1, b1, w2, b2)
    assert y.shape == (batch, seq, embed_dim)
    assert jnp.allclose(y, ref, atol=1e-4, rtol=1e-4), \
        float(jnp.max(jnp.abs(y - ref)))

    # --- force the tiled (F / output-E) accumulator path, still small -----
    E2, F2 = 256, 384
    x2 = jax.random.normal(kx2, (4, 32, E2), jnp.float32)
    p2 = init_params(kp2, E2, F2)
    y2 = feed_forward(x2, *p2, tf=128, tn=128)
    jax.block_until_ready(y2)
    ref2 = ffn_ref(x2, *p2)
    rel = float(jnp.max(jnp.abs(y2 - ref2)) / (jnp.max(jnp.abs(ref2)) + 1e-6))
    assert y2.shape == x2.shape
    assert rel < 2e-3, rel

    print("KERNEL_OK")
</pallas_src>

<mosaic_0001>
module attributes {stable_mosaic.version = 11 : i64} {
  func.func @ffn_kernel_resident(%arg0: i32, %arg1: memref<16x128xf32, #tpu.memory_space<vmem>>, %arg2: memref<128x128xf32, #tpu.memory_space<vmem>>, %arg3: memref<1x128xf32, #tpu.memory_space<vmem>>, %arg4: memref<128x128xf32, #tpu.memory_space<vmem>>, %arg5: memref<1x128xf32, #tpu.memory_space<vmem>>, %arg6: memref<16x128xf32, #tpu.memory_space<vmem>>) attributes {dimension_semantics = [#tpu.dimension_semantics<parallel>], iteration_bounds = array<i64: 1>, scalar_prefetch = 0 : i64, scratch_operands = 0 : i64, tpu.core_type = #tpu.core_type<tc>, window_params = [{transform_indices = @transform_0, window_bounds = array<i64: 16, 128>}, {pipeline_mode = #tpu.pipeline_mode<synchronous>, transform_indices = @transform_1, window_bounds = array<i64: 128, 128>}, {pipeline_mode = #tpu.pipeline_mode<synchronous>, transform_indices = @transform_2, window_bounds = array<i64: 1, 128>}, {pipeline_mode = #tpu.pipeline_mode<synchronous>, transform_indices = @transform_3, window_bounds = array<i64: 128, 128>}, {pipeline_mode = #tpu.pipeline_mode<synchronous>, transform_indices = @transform_4, window_bounds = array<i64: 1, 128>}, {transform_indices = @transform_5, window_bounds = array<i64: 16, 128>}]} {
    %c0 = arith.constant 0 : index
    %c0_0 = arith.constant 0 : index
    %0 = vector.load %arg1[%c0, %c0_0] : memref<16x128xf32, #tpu.memory_space<vmem>>, vector<16x128xf32>
    %c0_1 = arith.constant 0 : index
    %c0_2 = arith.constant 0 : index
    %1 = vector.load %arg2[%c0_1, %c0_2] : memref<128x128xf32, #tpu.memory_space<vmem>>, vector<128x128xf32>
    %cst = arith.constant dense<0.000000e+00> : vector<16x128xf32>
    %2 = tpu.matmul %0, %1, %cst {dimension_numbers = #tpu.dot_dimension_numbers<[1], [0], [0], [1], [0, 0, 1, 1], [], []>} : vector<16x128xf32>, vector<128x128xf32>, vector<16x128xf32> -> vector<16x128xf32>
    %c0_3 = arith.constant 0 : index
    %c0_4 = arith.constant 0 : index
    %3 = vector.load %arg3[%c0_3, %c0_4] : memref<1x128xf32, #tpu.memory_space<vmem>>, vector<1x128xf32>
    %4 = vector.broadcast %3 : vector<1x128xf32> to vector<16x128xf32>
    %5 = arith.addf %2, %4 : vector<16x128xf32>
    %cst_5 = arith.constant 0.000000e+00 : f32
    %6 = vector.broadcast %cst_5 : f32 to vector<16x128xf32>
    %7 = arith.maximumf %5, %6 : vector<16x128xf32>
    %c0_6 = arith.constant 0 : index
    %c0_7 = arith.constant 0 : index
    %8 = vector.load %arg4[%c0_6, %c0_7] : memref<128x128xf32, #tpu.memory_space<vmem>>, vector<128x128xf32>
    %cst_8 = arith.constant dense<0.000000e+00> : vector<16x128xf32>
    %9 = tpu.matmul %7, %8, %cst_8 {dimension_numbers = #tpu.dot_dimension_numbers<[1], [0], [0], [1], [0, 0, 1, 1], [], []>} : vector<16x128xf32>, vector<128x128xf32>, vector<16x128xf32> -> vector<16x128xf32>
    %c0_9 = arith.constant 0 : index
    %c0_10 = arith.constant 0 : index
    %10 = vector.load %arg5[%c0_9, %c0_10] : memref<1x128xf32, #tpu.memory_space<vmem>>, vector<1x128xf32>
    %11 = vector.broadcast %10 : vector<1x128xf32> to vector<16x128xf32>
    %12 = arith.addf %9, %11 : vector<16x128xf32>
    %c0_11 = arith.constant 0 : index
    %c0_12 = arith.constant 0 : index
    %13 = vector.load %arg6[%c0_11, %c0_12] : memref<16x128xf32, #tpu.memory_space<vmem>>, vector<16x128xf32>
    tpu.vector_store %arg6[%c0_11, %c0_12], %12 {strides = array<i32>} : memref<16x128xf32, #tpu.memory_space<vmem>>, vector<16x128xf32>,
    return
  }
  func.func @transform_0(%arg0: i32) -> (i32, i32) {
    %c0_i32 = arith.constant 0 : i32
    %c0_i32_0 = arith.constant 0 : i32
    return %arg0, %c0_i32 : i32, i32
  }
  func.func @transform_1(%arg0: i32) -> (i32, i32) {
    %c0_i32 = arith.constant 0 : i32
    %c0_i32_0 = arith.constant 0 : i32
    %c0_i32_1 = arith.constant 0 : i32
    return %c0_i32, %c0_i32_0 : i32, i32
  }
  func.func @transform_2(%arg0: i32) -> (i32, i32) {
    %c0_i32 = arith.constant 0 : i32
    %c0_i32_0 = arith.constant 0 : i32
    %c0_i32_1 = arith.constant 0 : i32
    return %c0_i32, %c0_i32_0 : i32, i32
  }
  func.func @transform_3(%arg0: i32) -> (i32, i32) {
    %c0_i32 = arith.constant 0 : i32
    %c0_i32_0 = arith.constant 0 : i32
    %c0_i32_1 = arith.constant 0 : i32
    return %c0_i32, %c0_i32_0 : i32, i32
  }
  func.func @transform_4(%arg0: i32) -> (i32, i32) {
    %c0_i32 = arith.constant 0 : i32
    %c0_i32_0 = arith.constant 0 : i32
    %c0_i32_1 = arith.constant 0 : i32
    return %c0_i32, %c0_i32_0 : i32, i32
  }
  func.func @transform_5(%arg0: i32) -> (i32, i32) {
    %c0_i32 = arith.constant 0 : i32
    %c0_i32_0 = arith.constant 0 : i32
    return %arg0, %c0_i32 : i32, i32
  }
}

</mosaic_0001>

<bundles_post_ra>
// kernel: tpu_custom_call.1
= control target key start
LH: loop header
LB: loop body
LE: loop exit
PB: predicated region body
PF: predicated region fallthrough
CT: control target
= control target key end

     0   :  { %10 = vsyncpa [#allocation3], 0  ;;  %s548_s0 = inlined_call_operand.hbm [shape: f32[16,128], index: 0, kind: input, shape index: {}]   ;;  %s549_s1 = inlined_call_operand.hbm [shape: f32[128,128], index: 1, kind: input, shape index: {}]   ;;  %s550_s2 = inlined_call_operand.vmem [shape: f32[1,128], index: 2, kind: input, shape index: {}]   ;;  %s551_s3 = inlined_call_operand.hbm [shape: f32[128,128], index: 3, kind: input, shape index: {}]   ;;  %s552_s4 = inlined_call_operand.vmem [shape: f32[1,128], index: 4, kind: input, shape index: {}]   ;;  %s553_s5 = inlined_call_operand.hbm [shape: f32[16,128], index: 5, kind: output, shape index: {}]  }
   0x1   :  { %11 = vsyncpa [#allocation6], 0 }
   0x2   :  { %12 = vsyncpa [#allocation4], 0  ;;  %s482_s18 = smov [#allocation5]   ;;  %s483_s20 = smov [#allocation2]  }
   0x3   :  { %s30_s19 = sshll.u32 %s482_s18, 4  ;;  %s18_s21 = sshll.u32 %s483_s20, 4  ;;  %s31_s19 = int_to_ptr.vmem [resolvable:$true] %s30_s19  ;;  %s19_s21 = int_to_ptr.vmem [resolvable:$true] %s18_s21 }
   0x4   :  { %s404_s22 = scalar_lea.vmem %s31_s19, 2048  ;;  %p409_p1 = scmp.lt.s32.totalorder %s31_s19, %s31_s19 }
   0x5   :  { %p405_p0 = scmp.ne.s32.totalorder %s31_s19, %s404_s22  ;;  %p410_p2 = scmp.lt.s32.totalorder %s404_s22, %s404_s22 }
   0x7   :  { %p411_p3 = por %p410_p2, %p409_p1 }
   0x9   :  { %p412_p4 = pnand %p411_p3, %p405_p0 }
   0xb   :  { %415 = shalt.err (!%p412_p4)
}
   0xc   :  { %s484_s23 = smov 128   ;;  %s485_s24 = smov 8  }
   0xd   :  { %36 = dma.hbm_to_vmem [thread:$0]  %s549_s1, 2048, %s31_s19, [#allocation6], %s484_s23, %s484_s23, %s485_s24  }
   0xe   :  { %s424_s27 = scalar_lea.vmem %s19_s21, 256  ;;  %p429_p6 = scmp.lt.s32.totalorder %s19_s21, %s19_s21 }
   0xf   :  { %p425_p5 = scmp.ne.s32.totalorder %s19_s21, %s424_s27  ;;  %p430_p7 = scmp.lt.s32.totalorder %s424_s27, %s424_s27 }
  0x11   :  { %p431_p8 = por %p430_p7, %p429_p6 }
  0x13   :  { %p432_p9 = pnand %p431_p8, %p425_p5 }
  0x15   :  { %435 = shalt.err (!%p432_p9)
}
  0x16   :  { %24 = dma.hbm_to_vmem [thread:$0]  %s548_s0, 256, %s19_s21, [#allocation3], %s484_s23, %s484_s23, %s485_s24  }
  0x17   :  { %s486_s30 = smov [#allocation7]  }
  0x18   :  { %s44_s6 = sshll.u32 %s486_s30, 4  ;;  %s45_s6 = int_to_ptr.vmem [resolvable:$true] %s44_s6 }
  0x19   :  { %s444_s7 = scalar_lea.vmem %s45_s6, 2048  ;;  %p449_p11 = scmp.lt.s32.totalorder %s45_s6, %s45_s6 }
  0x1a   :  { %p445_p10 = scmp.ne.s32.totalorder %s45_s6, %s444_s7  ;;  %p450_p12 = scmp.lt.s32.totalorder %s444_s7, %s444_s7 }
  0x1c   :  { %p451_p13 = por %p450_p12, %p449_p11 }
  0x1e   :  { %p452_p0 = pnand %p451_p13, %p445_p10 }
  0x20   :  { %455 = shalt.err (!%p452_p0)
}
  0x21   :  { %50 = dma.hbm_to_vmem [thread:$0]  %s551_s3, 2048, %s45_s6, [#allocation6], %s484_s23, %s484_s23, %s485_s24  }
  0x22   :  { %476 = dma.done.wait [#allocation3], 256  }
  0x23   :  { %477 = vsyncadd [#allocation3], 4294967040 }
  0x24   :  { %478 = dma.done.wait [#allocation6], 4096  }
  0x25   :  { %479 = vsyncadd [#allocation6], 4294963200  ;;  %v79_v0 = vld [vmem:[#allocation5 + $0x78] sm:$0xff]  ;;  %v78_v1 = vld [vmem:[#allocation5 + $0x70] sm:$0xff]  ;;  %s487_s11 = smov [#allocation8]  }
  0x26   :  { %320 = vmatprep.subr.mxu0 %v79_v0  ;;  %v77_v2 = vld [vmem:[#allocation5 + $0x68] sm:$0xff]  ;;  %v76_v3 = vld [vmem:[#allocation5 + $0x60] sm:$0xff]  ;;  %v62_v4 = vld [vmem:[#allocation2] sm:$0xff]  ;;  %s269_s12 = sshll.u32 %s487_s11, 4  ;;  %s270_s12 = int_to_ptr.vmem [resolvable:$true] %s269_s12 }
  0x27   :  { %321 = vmatpush3.msra.mxu0 %v79_v0  ;;  %v75_v5 = vld [vmem:[#allocation5 + $0x58] sm:$0xff]  ;;  %352 = vmatprep.mubr.f32.mxu0 %v62_v4  ;;  %v178_v7 = vld [vmem:[#allocation7 + $0x70] sm:$0xff]  ;;  %v177_v9 = vld [vmem:[#allocation7 + $0x68] sm:$0xff]  ;;  %p461_p2 = scmp.lt.s32.totalorder %s270_s12, %s270_s12 }
  0x28   :  { %322 = vmatprep.subr.mxu0 %v78_v1  ;;  %v179_v6 = vld [vmem:[#allocation7 + $0x78] sm:$0xff]  ;;  %v74_v8 = vld [vmem:[#allocation5 + $0x50] sm:$0xff]  ;;  %v73_v10 = vld [vmem:[#allocation5 + $0x48] sm:$0xff] }
  0x29   :  { %323 = vmatpush3.msra.mxu0 %v78_v1  ;;  %355 = vmatprep.subr.mxu1 %v179_v6  ;;  %v176_v11 = vld [vmem:[#allocation7 + $0x60] sm:$0xff]  ;;  %v175_v13 = vld [vmem:[#allocation7 + $0x58] sm:$0xff]  ;;  %v174_v15 = vld [vmem:[#allocation7 + $0x50] sm:$0xff] }
  0x2a   :  { %324 = vmatprep.subr.mxu0 %v77_v2  ;;  %356 = vmatpush3.msra.mxu1 %v179_v6  ;;  %v72_v12 = vld [vmem:[#allocation5 + $0x40] sm:$0xff]  ;;  %v71_v14 = vld [vmem:[#allocation5 + $0x38] sm:$0xff]  ;;  %v70_v16 = vld [vmem:[#allocation5 + $0x30] sm:$0xff] }
  0x2b   :  { %325 = vmatpush3.msra.mxu0 %v77_v2  ;;  %357 = vmatprep.subr.mxu1 %v178_v7  ;;  %v173_v17 = vld [vmem:[#allocation7 + $0x48] sm:$0xff]  ;;  %v172_v19 = vld [vmem:[#allocation7 + $0x40] sm:$0xff]  ;;  %v171_v21 = vld [vmem:[#allocation7 + $0x38] sm:$0xff] }
  0x2c   :  { %326 = vmatprep.subr.mxu0 %v76_v3  ;;  %358 = vmatpush3.msra.mxu1 %v178_v7  ;;  %v69_v18 = vld [vmem:[#allocation5 + $0x28] sm:$0xff]  ;;  %v68_v20 = vld [vmem:[#allocation5 + $0x20] sm:$0xff]  ;;  %v67_v22 = vld [vmem:[#allocation5 + $0x18] sm:$0xff] }
  0x2d   :  { %327 = vmatpush3.msra.mxu0 %v76_v3  ;;  %359 = vmatprep.subr.mxu1 %v177_v9  ;;  %v170_v23 = vld [vmem:[#allocation7 + $0x30] sm:$0xff]  ;;  %v169_v25 = vld [vmem:[#allocation7 + $0x28] sm:$0xff]  ;;  %v168_v27 = vld [vmem:[#allocation7 + $0x20] sm:$0xff] }
  0x2e   :  { %328 = vmatprep.subr.mxu0 %v75_v5  ;;  %360 = vmatpush3.msra.mxu1 %v177_v9  ;;  %v66_v24 = vld [vmem:[#allocation5 + $0x10] sm:$0xff]  ;;  %v65_v26 = vld [vmem:[#allocation5 + $0x8] sm:$0xff]  ;;  %v64_v28 = vld [vmem:[#allocation5] sm:$0xff] }
  0x2f   :  { %329 = vmatpush3.msra.mxu0 %v75_v5  ;;  %361 = vmatprep.subr.mxu1 %v176_v11  ;;  %v63_v29 = vld [vmem:[#allocation2 + $0x8] sm:$0xff]  ;;  %v166_v31 = vld [vmem:[#allocation7 + $0x10] sm:$0xff]  ;;  %v165_v32 = vld [vmem:[#allocation7 + $0x8] sm:$0xff] }
  0x30   :  { %330 = vmatprep.subr.mxu0 %v74_v8  ;;  %362 = vmatpush3.msra.mxu1 %v176_v11  ;;  %v167_v30 = vld [vmem:[#allocation7 + $0x18] sm:$0xff]  ;;  %v164_v33 = vld [vmem:[#allocation7] sm:$0xff]  ;;  %v282_v34 = vld [vmem:[%s550_s2] ss:$0 sm:$0xff]  ;;  %s456_s2 = scalar_lea.vmem %s270_s12, 256 }
  0x31   :  { %331 = vmatpush3.msra.mxu0 %v74_v8  ;;  %363 = vmatprep.subr.mxu1 %v175_v13  ;;  %v283_v41 = vld [vmem:[%s552_s4] ss:$0 sm:$0xff]  ;;  %p457_p1 = scmp.ne.s32.totalorder %s270_s12, %s456_s2  ;;  %p462_p3 = scmp.lt.s32.totalorder %s456_s2, %s456_s2 }
  0x32   :  { %332 = vmatprep.subr.mxu0 %v73_v10  ;;  %364 = vmatpush3.msra.mxu1 %v175_v13 }
  0x33   :  { %333 = vmatpush3.msra.mxu0 %v73_v10  ;;  %365 = vmatprep.subr.mxu1 %v174_v15  ;;  %p463_p4 = por %p462_p3, %p461_p2 }
  0x34   :  { %334 = vmatprep.subr.mxu0 %v72_v12  ;;  %366 = vmatpush3.msra.mxu1 %v174_v15 }
  0x35   :  { %335 = vmatpush3.msra.mxu0 %v72_v12  ;;  %367 = vmatprep.subr.mxu1 %v173_v17  ;;  %p464_p5 = pnand %p463_p4, %p457_p1 }
  0x36   :  { %336 = vmatprep.subr.mxu0 %v71_v14  ;;  %368 = vmatpush3.msra.mxu1 %v173_v17 }
  0x37   :  { %337 = vmatpush3.msra.mxu0 %v71_v14  ;;  %369 = vmatprep.subr.mxu1 %v172_v19 }
  0x38   :  { %338 = vmatprep.subr.mxu0 %v70_v16  ;;  %370 = vmatpush3.msra.mxu1 %v172_v19 }
  0x39   :  { %339 = vmatpush3.msra.mxu0 %v70_v16  ;;  %371 = vmatprep.subr.mxu1 %v171_v21 }
  0x3a   :  { %340 = vmatprep.subr.mxu0 %v69_v18  ;;  %372 = vmatpush3.msra.mxu1 %v171_v21 }
  0x3b   :  { %341 = vmatpush3.msra.mxu0 %v69_v18  ;;  %373 = vmatprep.subr.mxu1 %v170_v23 }
  0x3c   :  { %342 = vmatprep.subr.mxu0 %v68_v20  ;;  %374 = vmatpush3.msra.mxu1 %v170_v23 }
  0x3d   :  { %343 = vmatpush3.msra.mxu0 %v68_v20  ;;  %375 = vmatprep.subr.mxu1 %v169_v25 }
  0x3e   :  { %344 = vmatprep.subr.mxu0 %v67_v22  ;;  %376 = vmatpush3.msra.mxu1 %v169_v25 }
  0x3f   :  { %345 = vmatpush3.msra.mxu0 %v67_v22  ;;  %377 = vmatprep.subr.mxu1 %v168_v27 }
  0x40   :  { %346 = vmatprep.subr.mxu0 %v66_v24  ;;  %378 = vmatpush3.msra.mxu1 %v168_v27 }
  0x41   :  { %347 = vmatpush3.msra.mxu0 %v66_v24  ;;  %379 = vmatprep.subr.mxu1 %v167_v30 }
  0x42   :  { %348 = vmatprep.subr.mxu0 %v65_v26  ;;  %380 = vmatpush3.msra.mxu1 %v167_v30 }
  0x43   :  { %349 = vmatpush3.msra.mxu0 %v65_v26  ;;  %381 = vmatprep.subr.mxu1 %v166_v31 }
  0x44   :  { %350 = vmatprep.subr.mxu0 %v64_v28  ;;  %382 = vmatpush3.msra.mxu1 %v166_v31 }
  0x45   :  { %351 = vmatpush3.msra.mxu0 %v64_v28  ;;  %383 = vmatprep.subr.mxu1 %v165_v32 }
  0x46   :  { %353 = vmatmul.mubr.f32.vlgmr.msra.gmra.mxu0 %v63_v29  ;;  %384 = vmatpush3.msra.mxu1 %v165_v32 }
  0x47   :  { %385 = vmatprep.subr.mxu1 %v164_v33 }
  0x48   :  { %386 = vmatpush3.msra.mxu1 %v164_v33 }
 0x106   :  { %v354_v35 = vpop.f32.mrf.mxu0 }
 0x107   :  { %v159_v36 = vadd.f32 %v354_v35, %v282_v34 }
 0x108   :  { %v153_v37 = vpop.f32.mrf.mxu0 }
 0x109   :  { %v154_v38 = vadd.f32 %v282_v34, %v153_v37  ;;  %v163_v40 = vmax.f32 %v159_v36, 0.0 }
 0x10b   :  { %v162_v39 = vmax.f32 %v154_v38, 0.0 }
 0x10d   :  { %387 = vmatprep.mubr.f32.mxu1 %v162_v39 }
 0x10e   :  { %388 = vmatmul.mubr.f32.vlgmr.msra.gmra.mxu1 %v163_v40 }
 0x1ce   :  { %v389_v42 = vpop.f32.mrf.mxu1 }
 0x1cf   :  { %v259_v43 = vadd.f32 %v389_v42, %v283_v41 }
 0x1d0   :  { %v253_v44 = vpop.f32.mrf.mxu1 }
 0x1d1   :  { %263 = vst [vmem:[#allocation8 + $0x8] sm:$0xff] %v259_v43  ;;  %v254_v45 = vadd.f32 %v283_v41, %v253_v44 }
 0x1d3   :  { %262 = vst [vmem:[#allocation8] sm:$0xff] %v254_v45 }
 0x1d4   :  { %467 = shalt.err (!%p464_p5)
}
 0x1d5   :  { %275 = dma.vmem_to_hbm [thread:$0]  %s270_s12, 256, %s553_s5, [#allocation4], %s484_s23, %s484_s23, %s485_s24  }
 0x1d6   :  { %480 = dma.done.wait [#allocation4], 256  }
 0x1d7   :  { %481 = vsyncadd [#allocation4], 4294967040 }
 0x1d8   :  { %279 = vsyncpa [#allocation3], 1 }
 0x1d9   :  { %280 = vsyncpa [#allocation6], 1 }
 0x1da   :  { %281 = vsyncpa [#allocation4], 1 }

</bundles_post_ra>
